<compile_context>
chip_gen: v7x
topology: tpu7x:2x2x1
jax: 0.10.0
libtpu: 0.0.40
codegen_flags: <defaults>
</compile_context>

<pallas_src>
import functools

import jax
import jax.numpy as jnp
import numpy as np
from jax import lax
from jax.experimental import pallas as pl
from jax.experimental.pallas import tpu as pltpu

LANE = 128
TILE_M_MAX = 1024          # sublane-rows per grid step (sweep 512-2048 if desired)
CHUNK_CANDIDATES = (256, 128, 64, 32, 16, 8)
SMALL_N = 8 * LANE         # N <= 1024 rotations -> fused XLA fallback
_EPS = 1e-8


def _round_up(x, q):
    return -(-x // q) * q


def _rodrigues_rows(rx, ry, rz):
    """Shared Rodrigues math (sinc form). Returns the 9 row-major R entries."""
    ax = rx + _EPS
    ay = ry + _EPS
    az = rz + _EPS
    sumsq = ax * ax + ay * ay + az * az
    inv = lax.rsqrt(sumsq)            # 1 / ||r + eps||   (EUP rsqrt)
    t = sumsq * inv                   # ||r + eps||
    s = jnp.sin(t)
    c = jnp.cos(t)
    a = s * inv                       # sin(t)/t
    b = (1.0 - c) * (inv * inv)       # (1 - cos(t))/t^2

    sx = a * rx
    sy = a * ry
    sz = a * rz
    bx = b * rx
    by = b * ry
    bz = b * rz
    cxy = bx * ry
    cxz = bx * rz
    cyz = by * rz
    cxx = bx * rx
    cyy = by * ry
    czz = bz * rz

    return (
        1.0 - (cyy + czz), cxy - sz,         cxz + sy,
        cxy + sz,          1.0 - (cxx + czz), cyz - sx,
        cxz - sy,          cyz + sx,          1.0 - (cxx + cyy),
    )


def _rodrigues_kernel(r_ref, o_ref, *, chunk):
    # r_ref: (3, tile_m, 128) block; o_ref: (9, tile_m, 128) block
    tile_m = r_ref.shape[1]
    n_chunks = tile_m // chunk

    def do_chunk(start):
        r = r_ref[:, pl.ds(start, chunk), :]          # (3, chunk, 128)
        rows = _rodrigues_rows(r[0], r[1], r[2])
        for k in range(9):                            # nine direct lane-dense stores
            o_ref[k, pl.ds(start, chunk), :] = rows[k].astype(o_ref.dtype)

    if n_chunks == 1:
        do_chunk(0)
    else:
        # Bounds live ranges / spill scratch for large tiles (vreg/spill guard).
        @pl.loop(0, n_chunks)
        def _(i):
            do_chunk(pl.multiple_of(i * chunk, chunk))


def _pick_chunk(tile_m, quantum):
    for c in CHUNK_CANDIDATES:
        if c <= tile_m and tile_m % c == 0 and c % quantum == 0:
            return c
    return tile_m


def _rodrigues_pallas(rv_planar, tile_m, out_dtype):
    """rv_planar: (3, m_pad, 128) f32, m_pad % tile_m == 0 -> (9, m_pad, 128)."""
    _, m_pad, _ = rv_planar.shape
    quantum = 16 if jnp.dtype(out_dtype) == jnp.dtype(jnp.bfloat16) else 8
    chunk = _pick_chunk(tile_m, quantum)
    kernel = functools.partial(_rodrigues_kernel, chunk=chunk)
    return pl.pallas_call(
        kernel,
        out_shape=jax.ShapeDtypeStruct((9, m_pad, LANE), out_dtype),
        grid_spec=pltpu.PrefetchScalarGridSpec(
            num_scalar_prefetch=0,
            grid=(m_pad // tile_m,),
            in_specs=[pl.BlockSpec((3, tile_m, LANE), lambda i: (0, i, 0))],
            out_specs=pl.BlockSpec((9, tile_m, LANE), lambda i: (0, i, 0)),
        ),
        compiler_params=pltpu.CompilerParams(
            dimension_semantics=("parallel",),
            vmem_limit_bytes=32 * 1024 * 1024,
        ),
    )(rv_planar)


def _select_tiling(m, max_tile_m, quantum, min_steps=4):
    """Choose (tile_m, m_pad) so non-trivial N gets >= min_steps parallel steps."""
    m_q = _round_up(max(m, 1), quantum)
    if m_q <= quantum:                       # tiny: one small block
        return m_q, m_q
    target = _round_up(-(-m_q // min_steps), quantum)
    tile_m = max(quantum, min(max_tile_m, target))
    tile_m = _round_up(tile_m, quantum)
    m_pad = _round_up(m_q, tile_m)
    return tile_m, m_pad


def _rodrigues_xla(rv):
    """Fused pure-XLA path for small N (dispatch-latency bound)."""
    rows = _rodrigues_rows(rv[:, 0], rv[:, 1], rv[:, 2])
    return jnp.stack(rows, axis=-1).reshape(-1, 3, 3)


class AADecoder:
    """JAX/Pallas port of human_shape AADecoder."""

    def __init__(self, num_angles, dtype=jnp.float32, mean=None):
        self.num_angles = num_angles
        self.dtype = dtype
        if isinstance(mean, dict):
            mean = mean.get("aa", None)
        if mean is None:
            mean = jnp.zeros([num_angles * 3], dtype=dtype)
        mean = jnp.asarray(mean, dtype=dtype).reshape(-1)
        self.mean = mean  # registered buffer (unused in forward, kept for parity)

    def get_dim_size(self):
        return self.num_angles * 3

    def get_mean(self):
        return jnp.zeros([self.get_dim_size()], dtype=self.dtype)

    def __call__(self, module_input, *, max_tile_m=TILE_M_MAX, use_pallas=None,
                 store_dtype=None, planar_output=False):
        rv = jnp.asarray(module_input).reshape(-1, 3).astype(jnp.float32)  # (N, 3)
        n = rv.shape[0]

        if use_pallas is None:
            use_pallas = n > SMALL_N

        if not use_pallas:
            rot = _rodrigues_xla(rv)                              # (N, 3, 3)
            if planar_output:
                return rot.reshape(n, 9).T.astype(self.dtype)     # (9, N) slab
            return rot.reshape(-1, self.num_angles, 3, 3).astype(self.dtype)

        out_dtype = jnp.float32 if store_dtype is None else jnp.dtype(store_dtype)
        quantum = 16 if out_dtype == jnp.dtype(jnp.bfloat16) else 8

        m = -(-n // LANE)                                         # ceil(N / 128)
        tile_m, m_pad = _select_tiling(m, max_tile_m, quantum)
        L = m_pad * LANE

        # Pad then transpose in one shot (single XLA transpose).
        # TODO(synk): accept/produce the (3, N) component-major layout upstream
        # to drop this layout pass entirely.
        planar = jnp.pad(rv, ((0, L - n), (0, 0))).T.reshape(3, m_pad, LANE)

        out_planar = _rodrigues_pallas(planar, tile_m, out_dtype)  # (9, m_pad, 128)
        slab = out_planar.reshape(9, L)[:, :n]                     # (9, N) row-major R
        if planar_output:
            return slab.astype(self.dtype)
        rot = slab.T.reshape(-1, self.num_angles, 3, 3)
        return rot.astype(self.dtype)


def _reference_batch_rodrigues(rot_vecs):
    # pure-JAX reference matching the torch implementation
    angle = jnp.linalg.norm(rot_vecs + _EPS, axis=1, keepdims=True)
    rot_dir = rot_vecs / angle
    cos = jnp.cos(angle)[:, None, :]
    sin = jnp.sin(angle)[:, None, :]
    rx, ry, rz = rot_dir[:, 0], rot_dir[:, 1], rot_dir[:, 2]
    zeros = jnp.zeros_like(rx)
    K = jnp.stack(
        [zeros, -rz, ry, rz, zeros, -rx, -ry, rx, zeros], axis=1
    ).reshape(-1, 3, 3)
    ident = jnp.eye(3, dtype=rot_vecs.dtype)[None]
    return ident + sin * K + (1.0 - cos) * jnp.matmul(K, K)


if __name__ == "__main__":
    key = jax.random.PRNGKey(0)

    # --- primary small test (typical module use; forced through the Pallas path
    #     and through the fused-XLA small-N path) ---
    batch, num_angles = 2, 8
    module_input = jax.random.normal(key, (batch, num_angles * 3), dtype=jnp.float32)
    decoder = AADecoder(num_angles=num_angles)
    ref = _reference_batch_rodrigues(module_input.reshape(-1, 3)).reshape(
        batch, num_angles, 3, 3
    )

    out_pallas = jax.block_until_ready(decoder(module_input, use_pallas=True))
    assert out_pallas.shape == (batch, num_angles, 3, 3), out_pallas.shape
    np.testing.assert_allclose(np.asarray(out_pallas), np.asarray(ref),
                               atol=1e-5, rtol=1e-5)

    out_xla = jax.block_until_ready(decoder(module_input))  # small-N fallback
    np.testing.assert_allclose(np.asarray(out_xla), np.asarray(ref),
                               atol=1e-5, rtol=1e-5)

    # --- multi-step (tiled, multi "parallel" grid step) Pallas path ---
    batch2, num_angles2 = 64, 24                 # N = 1536 -> M = 12 sublane-rows
    key2 = jax.random.PRNGKey(1)
    module_input2 = jax.random.normal(
        key2, (batch2, num_angles2 * 3), dtype=jnp.float32
    )
    decoder2 = AADecoder(num_angles=num_angles2)
    out2 = jax.block_until_ready(
        decoder2(module_input2, use_pallas=True, max_tile_m=8)  # grid=(2,)
    )
    ref2 = _reference_batch_rodrigues(module_input2.reshape(-1, 3)).reshape(
        batch2, num_angles2, 3, 3
    )
    np.testing.assert_allclose(np.asarray(out2), np.asarray(ref2),
                               atol=1e-5, rtol=1e-5)

    # --- bf16-store path (compute stays f32; looser tolerance) ---
    out_bf16 = jax.block_until_ready(
        decoder2(module_input2, use_pallas=True, store_dtype=jnp.bfloat16)
    )
    np.testing.assert_allclose(np.asarray(out_bf16), np.asarray(ref2),
                               atol=1e-2, rtol=1e-2)

    # --- planar (component-major) output handoff, skipping the out-transpose ---
    slab = jax.block_until_ready(
        decoder2(module_input2, use_pallas=True, planar_output=True)
    )
    np.testing.assert_allclose(
        np.asarray(slab).T.reshape(-1, num_angles2, 3, 3),
        np.asarray(ref2), atol=1e-5, rtol=1e-5
    )

    print("KERNEL_OK")
</pallas_src>

<mosaic_0001>
module attributes {stable_mosaic.version = 11 : i64} {
  func.func @_rodrigues_kernel(%arg0: i32, %arg1: memref<3x8x128xf32, #tpu.memory_space<vmem>>, %arg2: memref<9x8x128xf32, #tpu.memory_space<vmem>>) attributes {dimension_semantics = [#tpu.dimension_semantics<parallel>], iteration_bounds = array<i64: 1>, scalar_prefetch = 0 : i64, scratch_operands = 0 : i64, tpu.core_type = #tpu.core_type<tc>, window_params = [{transform_indices = @transform_0, window_bounds = array<i64: 3, 8, 128>}, {transform_indices = @transform_1, window_bounds = array<i64: 9, 8, 128>}]} {
    %c0 = arith.constant 0 : index
    %c0_0 = arith.constant 0 : index
    %c0_1 = arith.constant 0 : index
    %0 = vector.load %arg1[%c0, %c0_0, %c0_1] : memref<3x8x128xf32, #tpu.memory_space<vmem>>, vector<3x8x128xf32>
    %1 = vector.extract_strided_slice %0 {offsets = [0, 0, 0], sizes = [1, 8, 128], strides = [1, 1, 1]} : vector<3x8x128xf32> to vector<1x8x128xf32>
    %2 = vector.shape_cast %1 : vector<1x8x128xf32> to vector<8x128xf32>
    %3 = vector.extract_strided_slice %0 {offsets = [1, 0, 0], sizes = [1, 8, 128], strides = [1, 1, 1]} : vector<3x8x128xf32> to vector<1x8x128xf32>
    %4 = vector.shape_cast %3 : vector<1x8x128xf32> to vector<8x128xf32>
    %5 = vector.extract_strided_slice %0 {offsets = [2, 0, 0], sizes = [1, 8, 128], strides = [1, 1, 1]} : vector<3x8x128xf32> to vector<1x8x128xf32>
    %6 = vector.shape_cast %5 : vector<1x8x128xf32> to vector<8x128xf32>
    %cst = arith.constant 9.99999993E-9 : f32
    %7 = vector.broadcast %cst : f32 to vector<8x128xf32>
    %8 = arith.addf %2, %7 : vector<8x128xf32>
    %cst_2 = arith.constant 9.99999993E-9 : f32
    %9 = vector.broadcast %cst_2 : f32 to vector<8x128xf32>
    %10 = arith.addf %4, %9 : vector<8x128xf32>
    %cst_3 = arith.constant 9.99999993E-9 : f32
    %11 = vector.broadcast %cst_3 : f32 to vector<8x128xf32>
    %12 = arith.addf %6, %11 : vector<8x128xf32>
    %13 = arith.mulf %8, %8 : vector<8x128xf32>
    %14 = arith.mulf %10, %10 : vector<8x128xf32>
    %15 = arith.addf %13, %14 : vector<8x128xf32>
    %16 = arith.mulf %12, %12 : vector<8x128xf32>
    %17 = arith.addf %15, %16 : vector<8x128xf32>
    %18 = math.rsqrt %17 : vector<8x128xf32>
    %19 = arith.mulf %17, %18 : vector<8x128xf32>
    %20 = math.sin %19 : vector<8x128xf32>
    %21 = math.cos %19 : vector<8x128xf32>
    %22 = arith.mulf %20, %18 : vector<8x128xf32>
    %cst_4 = arith.constant 1.000000e+00 : f32
    %23 = vector.broadcast %cst_4 : f32 to vector<8x128xf32>
    %24 = arith.subf %23, %21 : vector<8x128xf32>
    %25 = arith.mulf %18, %18 : vector<8x128xf32>
    %26 = arith.mulf %24, %25 : vector<8x128xf32>
    %27 = arith.mulf %22, %2 : vector<8x128xf32>
    %28 = arith.mulf %22, %4 : vector<8x128xf32>
    %29 = arith.mulf %22, %6 : vector<8x128xf32>
    %30 = arith.mulf %26, %2 : vector<8x128xf32>
    %31 = arith.mulf %26, %4 : vector<8x128xf32>
    %32 = arith.mulf %26, %6 : vector<8x128xf32>
    %33 = arith.mulf %30, %4 : vector<8x128xf32>
    %34 = arith.mulf %30, %6 : vector<8x128xf32>
    %35 = arith.mulf %31, %6 : vector<8x128xf32>
    %36 = arith.mulf %30, %2 : vector<8x128xf32>
    %37 = arith.mulf %31, %4 : vector<8x128xf32>
    %38 = arith.mulf %32, %6 : vector<8x128xf32>
    %39 = arith.addf %37, %38 : vector<8x128xf32>
    %cst_5 = arith.constant 1.000000e+00 : f32
    %40 = vector.broadcast %cst_5 : f32 to vector<8x128xf32>
    %41 = arith.subf %40, %39 : vector<8x128xf32>
    %42 = arith.subf %33, %29 : vector<8x128xf32>
    %43 = arith.addf %34, %28 : vector<8x128xf32>
    %44 = arith.addf %33, %29 : vector<8x128xf32>
    %45 = arith.addf %36, %38 : vector<8x128xf32>
    %cst_6 = arith.constant 1.000000e+00 : f32
    %46 = vector.broadcast %cst_6 : f32 to vector<8x128xf32>
    %47 = arith.subf %46, %45 : vector<8x128xf32>
    %48 = arith.subf %35, %27 : vector<8x128xf32>
    %49 = arith.subf %34, %28 : vector<8x128xf32>
    %50 = arith.addf %35, %27 : vector<8x128xf32>
    %51 = arith.addf %36, %37 : vector<8x128xf32>
    %cst_7 = arith.constant 1.000000e+00 : f32
    %52 = vector.broadcast %cst_7 : f32 to vector<8x128xf32>
    %53 = arith.subf %52, %51 : vector<8x128xf32>
    %c0_8 = arith.constant 0 : index
    %c0_9 = arith.constant 0 : index
    %c0_10 = arith.constant 0 : index
    %54 = vector.load %arg2[%c0_8, %c0_9, %c0_10] : memref<9x8x128xf32, #tpu.memory_space<vmem>>, vector<1x8x128xf32>
    %55 = vector.shape_cast %54 : vector<1x8x128xf32> to vector<8x128xf32>
    %56 = vector.shape_cast %41 : vector<8x128xf32> to vector<1x8x128xf32>
    tpu.vector_store %arg2[%c0_8, %c0_9, %c0_10], %56 {strides = array<i32>} : memref<9x8x128xf32, #tpu.memory_space<vmem>>, vector<1x8x128xf32>,
    %c1 = arith.constant 1 : index
    %c0_11 = arith.constant 0 : index
    %c0_12 = arith.constant 0 : index
    %57 = vector.load %arg2[%c1, %c0_11, %c0_12] : memref<9x8x128xf32, #tpu.memory_space<vmem>>, vector<1x8x128xf32>
    %58 = vector.shape_cast %57 : vector<1x8x128xf32> to vector<8x128xf32>
    %59 = vector.shape_cast %42 : vector<8x128xf32> to vector<1x8x128xf32>
    tpu.vector_store %arg2[%c1, %c0_11, %c0_12], %59 {strides = array<i32>} : memref<9x8x128xf32, #tpu.memory_space<vmem>>, vector<1x8x128xf32>,
    %c2 = arith.constant 2 : index
    %c0_13 = arith.constant 0 : index
    %c0_14 = arith.constant 0 : index
    %60 = vector.load %arg2[%c2, %c0_13, %c0_14] : memref<9x8x128xf32, #tpu.memory_space<vmem>>, vector<1x8x128xf32>
    %61 = vector.shape_cast %60 : vector<1x8x128xf32> to vector<8x128xf32>
    %62 = vector.shape_cast %43 : vector<8x128xf32> to vector<1x8x128xf32>
    tpu.vector_store %arg2[%c2, %c0_13, %c0_14], %62 {strides = array<i32>} : memref<9x8x128xf32, #tpu.memory_space<vmem>>, vector<1x8x128xf32>,
    %c3 = arith.constant 3 : index
    %c0_15 = arith.constant 0 : index
    %c0_16 = arith.constant 0 : index
    %63 = vector.load %arg2[%c3, %c0_15, %c0_16] : memref<9x8x128xf32, #tpu.memory_space<vmem>>, vector<1x8x128xf32>
    %64 = vector.shape_cast %63 : vector<1x8x128xf32> to vector<8x128xf32>
    %65 = vector.shape_cast %44 : vector<8x128xf32> to vector<1x8x128xf32>
    tpu.vector_store %arg2[%c3, %c0_15, %c0_16], %65 {strides = array<i32>} : memref<9x8x128xf32, #tpu.memory_space<vmem>>, vector<1x8x128xf32>,
    %c4 = arith.constant 4 : index
    %c0_17 = arith.constant 0 : index
    %c0_18 = arith.constant 0 : index
    %66 = vector.load %arg2[%c4, %c0_17, %c0_18] : memref<9x8x128xf32, #tpu.memory_space<vmem>>, vector<1x8x128xf32>
    %67 = vector.shape_cast %66 : vector<1x8x128xf32> to vector<8x128xf32>
    %68 = vector.shape_cast %47 : vector<8x128xf32> to vector<1x8x128xf32>
    tpu.vector_store %arg2[%c4, %c0_17, %c0_18], %68 {strides = array<i32>} : memref<9x8x128xf32, #tpu.memory_space<vmem>>, vector<1x8x128xf32>,
    %c5 = arith.constant 5 : index
    %c0_19 = arith.constant 0 : index
    %c0_20 = arith.constant 0 : index
    %69 = vector.load %arg2[%c5, %c0_19, %c0_20] : memref<9x8x128xf32, #tpu.memory_space<vmem>>, vector<1x8x128xf32>
    %70 = vector.shape_cast %69 : vector<1x8x128xf32> to vector<8x128xf32>
    %71 = vector.shape_cast %48 : vector<8x128xf32> to vector<1x8x128xf32>
    tpu.vector_store %arg2[%c5, %c0_19, %c0_20], %71 {strides = array<i32>} : memref<9x8x128xf32, #tpu.memory_space<vmem>>, vector<1x8x128xf32>,
    %c6 = arith.constant 6 : index
    %c0_21 = arith.constant 0 : index
    %c0_22 = arith.constant 0 : index
    %72 = vector.load %arg2[%c6, %c0_21, %c0_22] : memref<9x8x128xf32, #tpu.memory_space<vmem>>, vector<1x8x128xf32>
    %73 = vector.shape_cast %72 : vector<1x8x128xf32> to vector<8x128xf32>
    %74 = vector.shape_cast %49 : vector<8x128xf32> to vector<1x8x128xf32>
    tpu.vector_store %arg2[%c6, %c0_21, %c0_22], %74 {strides = array<i32>} : memref<9x8x128xf32, #tpu.memory_space<vmem>>, vector<1x8x128xf32>,
    %c7 = arith.constant 7 : index
    %c0_23 = arith.constant 0 : index
    %c0_24 = arith.constant 0 : index
    %75 = vector.load %arg2[%c7, %c0_23, %c0_24] : memref<9x8x128xf32, #tpu.memory_space<vmem>>, vector<1x8x128xf32>
    %76 = vector.shape_cast %75 : vector<1x8x128xf32> to vector<8x128xf32>
    %77 = vector.shape_cast %50 : vector<8x128xf32> to vector<1x8x128xf32>
    tpu.vector_store %arg2[%c7, %c0_23, %c0_24], %77 {strides = array<i32>} : memref<9x8x128xf32, #tpu.memory_space<vmem>>, vector<1x8x128xf32>,
    %c8 = arith.constant 8 : index
    %c0_25 = arith.constant 0 : index
    %c0_26 = arith.constant 0 : index
    %78 = vector.load %arg2[%c8, %c0_25, %c0_26] : memref<9x8x128xf32, #tpu.memory_space<vmem>>, vector<1x8x128xf32>
    %79 = vector.shape_cast %78 : vector<1x8x128xf32> to vector<8x128xf32>
    %80 = vector.shape_cast %53 : vector<8x128xf32> to vector<1x8x128xf32>
    tpu.vector_store %arg2[%c8, %c0_25, %c0_26], %80 {strides = array<i32>} : memref<9x8x128xf32, #tpu.memory_space<vmem>>, vector<1x8x128xf32>,
    return
  }
  func.func @transform_0(%arg0: i32) -> (i32, i32, i32) {
    %c0_i32 = arith.constant 0 : i32
    %c0_i32_0 = arith.constant 0 : i32
    %c0_i32_1 = arith.constant 0 : i32
    return %c0_i32, %arg0, %c0_i32_0 : i32, i32, i32
  }
  func.func @transform_1(%arg0: i32) -> (i32, i32, i32) {
    %c0_i32 = arith.constant 0 : i32
    %c0_i32_0 = arith.constant 0 : i32
    %c0_i32_1 = arith.constant 0 : i32
    return %c0_i32, %arg0, %c0_i32_0 : i32, i32, i32
  }
}

</mosaic_0001>

<bundles_post_ra>
// kernel: tpu_custom_call.1
= control target key start
LH: loop header
LB: loop body
LE: loop exit
PB: predicated region body
PF: predicated region fallthrough
CT: control target
= control target key end

     0   :  { %6 = vsyncpa [#allocation3], 0  ;;  %s479_s0 = inlined_call_operand.hbm [shape: f32[3,8,128], index: 0, kind: input, shape index: {}]   ;;  %s480_s1 = inlined_call_operand.hbm [shape: f32[9,8,128], index: 1, kind: output, shape index: {}]  }
   0x1   :  { %7 = vsyncpa [#allocation4], 0  ;;  %s381_s6 = smov [#allocation2]   ;;  %s333_s10 = scalar_lea.hbm %s479_s0, 384 }
   0x2   :  { %s13_s7 = sshll.u32 %s381_s6, 4  ;;  %p334_p0 = scmp.ne.s32.totalorder %s479_s0, %s333_s10  ;;  %s14_s7 = int_to_ptr.vmem [resolvable:$true] %s13_s7 }
   0x3   :  { %p337_p1 = scmp.lt.u32.totalorder %s333_s10, %s479_s0 }
   0x5   :  { %p339_p2 = pnand %p337_p1, %p334_p0 }
   0x7   :  { %342 = shalt.err (!%p339_p2)
}
   0x8   :  { %s343_s15 = scalar_lea.vmem %s14_s7, 384  ;;  %p348_p4 = scmp.lt.s32.totalorder %s14_s7, %s14_s7 }
   0x9   :  { %p344_p3 = scmp.ne.s32.totalorder %s14_s7, %s343_s15  ;;  %p349_p5 = scmp.lt.s32.totalorder %s343_s15, %s343_s15 }
   0xb   :  { %p350_p6 = por %p349_p5, %p348_p4 }
   0xd   :  { %p351_p7 = pnand %p350_p6, %p344_p3 }
   0xf   :  { %354 = shalt.err (!%p351_p7)
}
  0x10   :  { %s382_s16 = smov 128   ;;  %s383_s17 = smov 8  }
  0x11   :  { %19 = dma.hbm_to_vmem [thread:$0]  %s479_s0, 384, %s14_s7, [#allocation3], %s382_s16, %s382_s16, %s383_s17  }
  0x12   :  { %377 = dma.done.wait [#allocation3], 384  }
  0x13   :  { %378 = vsyncadd [#allocation3], 4294966912  ;;  %v416_v0 = vld [vmem:[#allocation2] sm:$0xff]  ;;  %v418_v1 = vld [vmem:[#allocation2 + $0x8] sm:$0xff]  ;;  %v384_v24 = vmov 683565275  }
  0x14   :  { %v420_v2 = vld [vmem:[#allocation2 + $0x10] sm:$0xff]  ;;  %v26_v3 = vadd.f32 1e-08, %v416_v0  ;;  %v27_v4 = vadd.f32 1e-08, %v418_v1  ;;  %s390_s0 = smov [#allocation5]  }
  0x15   :  { %v28_v5 = vadd.f32 1e-08, %v420_v2  ;;  %v385_v26 = vmov 2475754826   ;;  %v386_v28 = vmov 2131351028  }
  0x16   :  { %v29_v6 = vmul.f32 %v26_v3, %v26_v3  ;;  %v30_v7 = vmul.f32 %v27_v4, %v27_v4  ;;  %v387_v30 = vmov 2102212464   ;;  %v388_v32 = vmov 920167782   ;;  %s293_s20 = sshll.u32 %s390_s0, 4  ;;  %s294_s20 = int_to_ptr.vmem [resolvable:$true] %s293_s20 }
  0x17   :  { %v32_v8 = vmul.f32 %v28_v5, %v28_v5  ;;  %v389_v39 = vmov 1326507024   ;;  %s355_s21 = scalar_lea.vmem %s294_s20, 1152  ;;  %p360_p9 = scmp.lt.s32.totalorder %s294_s20, %s294_s20 }
  0x18   :  { %v31_v9 = vadd.f32 %v30_v7, %v29_v6  ;;  %p356_p8 = scmp.ne.s32.totalorder %s294_s20, %s355_s21  ;;  %p361_p10 = scmp.lt.s32.totalorder %s355_s21, %s355_s21 }
  0x1a   :  { %v33_v10 = vadd.f32 %v32_v8, %v31_v9  ;;  %p362_p11 = por %p361_p10, %p360_p9 }
  0x1c   :  { %327 = vrsqrt.f32 %v33_v10  ;;  %p363_p12 = pnand %p362_p11, %p356_p8 }
  0x26   :  { %v425_v11 = vpop.eup %327 }
  0x27   :  { %v428_v12 = vmul.f32 %v425_v11, %v33_v10 }
  0x29   :  { %v39_v13 = vand.u32 2139095040, %v428_v12  ;;  %v36_v15 = vand.u32 2147483647, %v428_v12  ;;  %vm38_vm7 = vcmp.lt.s32.totalorder %v428_v12, 0  ;;  %vm128_vm15 = vweird.f32 %v428_v12 }
  0x2b   :  { %v40_v14 = vshrl.u32 %v39_v13, 23  ;;  %v43_v18 = vand.u32 8388607, %v36_v15  ;;  %vm37_vm8 = vcmp.le.f32.partialorder %v36_v15, 0.7853982 }
  0x2d   :  { %v305_v16 = vadd.s32 4294967169, %v40_v14  ;;  %v44_v21 = vor.u32 8388608, %v43_v18 }
  0x2f   :  { %v46_v17 = vadd.s32 1, %v305_v16  ;;  %v84_v41 = vshll.u32 %v44_v21, 8 }
  0x31   :  { %vm47_vm0 = vcmp.gt.s32.totalorder %v46_v17, 0 }
  0x32   :  { %v48_v19 = vsel %vm47_vm0, %v46_v17, 0 }
  0x33   :  { %v50_v20 = vand.u32 31, %v48_v19  ;;  %v49_v22 = vshrl.u32 %v48_v19, 5 }
  0x35   :  { %v51_v23 = vsub.s32 32, %v50_v20  ;;  %v53_v25 = vshll.u32 %v384_v24, %v50_v20  ;;  %v56_v27 = vshll.u32 %v385_v26, %v50_v20  ;;  %v59_v29 = vshll.u32 %v386_v28, %v50_v20 }
  0x36   :  { %v62_v31 = vshll.u32 %v387_v30, %v50_v20  ;;  %v65_v33 = vshll.u32 %v388_v32, %v50_v20  ;;  %vm68_vm1 = vcmp.lt.s32.totalorder %v49_v22, 1  ;;  %vm71_vm2 = vcmp.lt.s32.totalorder %v49_v22, 4 }
  0x37   :  { %v52_v34 = vshrl.u32 %v384_v24, %v51_v23  ;;  %v54_v35 = vshrl.u32 %v385_v26, %v51_v23  ;;  %v57_v36 = vshrl.u32 %v386_v28, %v51_v23  ;;  %v60_v37 = vshrl.u32 %v387_v30, %v51_v23 }
  0x38   :  { %v63_v38 = vshrl.u32 %v388_v32, %v51_v23  ;;  %v66_v40 = vshrl.u32 %v389_v39, %v51_v23  ;;  %vm69_vm3 = vcmp.lt.s32.totalorder %v49_v22, 2  ;;  %vm70_vm4 = vcmp.lt.s32.totalorder %v49_v22, 3 }
  0x39   :  { %v55_v42 = vor.u32 %v54_v35, %v53_v25  ;;  %v58_v43 = vor.u32 %v57_v36, %v56_v27  ;;  %v61_v44 = vor.u32 %v60_v37, %v59_v29 }
  0x3a   :  { %v64_v45 = vor.u32 %v63_v38, %v62_v31  ;;  %v67_v46 = vor.u32 %v66_v40, %v65_v33 }
  0x3b   :  { %v72_v47 = vsel %vm68_vm1, %v52_v34, %v55_v42  ;;  %v73_v48 = vsel %vm71_vm2, %v61_v44, 2102212464  ;;  %v76_v49 = vsel %vm68_vm1, %v55_v42, %v58_v43  ;;  %v80_v50 = vsel %vm68_vm1, %v58_v43, %v61_v44 }
  0x3c   :  { %v74_v51 = vsel %vm70_vm4, %v58_v43, %v73_v48  ;;  %v77_v52 = vsel %vm71_vm2, %v64_v45, 920167782  ;;  %v81_v53 = vsel %vm71_vm2, %v67_v46, 1326507024 }
  0x3d   :  { %v78_v54 = vsel %vm70_vm4, %v61_v44, %v77_v52  ;;  %v82_v55 = vsel %vm70_vm4, %v64_v45, %v81_v53  ;;  %v75_v56 = vsel %vm69_vm3, %v72_v47, %v74_v51  ;;  %v245_v47 = vmul.f32 %v425_v11, %v425_v11 }
  0x3e   :  { %v79_v57 = vsel %vm69_vm3, %v76_v49, %v78_v54  ;;  %v83_v58 = vsel %vm69_vm3, %v80_v50, %v82_v55  ;;  %v91_v63 = vmul.u32 %v84_v41, %v75_v56 }
  0x3f   :  { %v434_v59 = vmul.u32.u64.low %v84_v41, %v83_v58  ;;  %v435_v60 = vmul.u32.u64.high %v84_v41, %v83_v58, %v434_v59  ;;  %v437_v61 = vmul.u32.u64.low %v84_v41, %v79_v57  ;;  %v438_v62 = vmul.u32.u64.high %v84_v41, %v79_v57, %v437_v61 }
  0x41   :  { %vm93_vm5 = vc.u32 %v435_v60, %v437_v61  ;;  %v94_v3 = vadd.s32 1, %v438_v62  ;;  %v92_v17 = vadd.s32 %v437_v61, %v435_v60 }
  0x43   :  { %v95_v4 = vsel %vm93_vm5, %v94_v3, %v438_v62 }
  0x44   :  { %v96_v5 = vadd.s32 %v95_v4, %v91_v63 }
  0x46   :  { %v97_v6 = vadd.s32 536870912, %v96_v5 }
  0x48   :  { %v98_v7 = vshrl.u32 %v97_v6, 30 }
  0x4a   :  { %v99_v8 = vshll.u32 %v98_v7, 30  ;;  %v122_v30 = vsub.s32 4, %v98_v7 }
  0x4c   :  { %v100_v9 = vsub.s32 %v96_v5, %v99_v8  ;;  %v123_v33 = vsel %vm38_vm7, %v122_v30, %v98_v7 }
  0x4d   :  { %v125_v35 = vsel %vm37_vm8, 0, %v123_v33 }
  0x4e   :  { %v102_v10 = vsub.s32 0, %v100_v9  ;;  %v129_v36 = vadd.s32 3, %v125_v35  ;;  %v233_v37 = vand.u32 3, %v125_v35 }
  0x50   :  { %v306_v13 = vmin.u32 %v102_v10, %v100_v9  ;;  %v130_v38 = vand.u32 3, %v129_v36  ;;  %vm238_vm9 = vcmp.eq.s32.totalorder %v233_v37, 2  ;;  %vm235_vm11 = vcmp.eq.s32.totalorder %v233_v37, 0 }
  0x51   :  { %vm234_vm13 = vcmp.lt.s32.totalorder %v233_v37, 2 }
  0x52   :  { %v104_v14 = vclz %v306_v13  ;;  %vm135_vm10 = vcmp.eq.s32.totalorder %v130_v38, 2  ;;  %vm132_vm12 = vcmp.eq.s32.totalorder %v130_v38, 0  ;;  %vm131_vm14 = vcmp.lt.s32.totalorder %v130_v38, 2 }
  0x54   :  { %v307_v16 = vadd.s32 4294967294, %v104_v14 }
  0x56   :  { %vm308_vm6 = vcmp.lt.s32.totalorder %v307_v16, 0 }
  0x57   :  { %v107_v18 = vsel %vm308_vm6, 0, %v307_v16 }
  0x58   :  { %v108_v19 = vsub.s32 32, %v107_v18  ;;  %v109_v20 = vshll.u32 %v100_v9, %v107_v18  ;;  %v112_v21 = vsub.s32 4294967266, %v107_v18 }
  0x5a   :  { %v110_v22 = vshrl.u32 %v92_v17, %v108_v19  ;;  %v113_v23 = vadd.s32 127, %v112_v21 }
  0x5c   :  { %v111_v24 = vor.u32 %v110_v22, %v109_v20  ;;  %v114_v25 = vshll.u32 %v113_v23, 23 }
  0x5e   :  { %v115_v26 = vor.u32 4788187, %v114_v25  ;;  %v118_v27 = vcvt.s32.f32 %v111_v24 }
  0x60   :  { %v116_v28 = vand.u32 2147483647, %v115_v26 }
  0x62   :  { %v119_v29 = vmul.f32 %v118_v27, %v116_v28 }
  0x64   :  { %v120_v31 = vxor.u32 2147483648, %v119_v29 }
  0x66   :  { %v121_v32 = vsel %vm38_vm7, %v120_v31, %v119_v29 }
  0x67   :  { %v124_v34 = vsel %vm37_vm8, %v428_v12, %v121_v32 }
  0x68   :  { %329 = vcosq.f32 %v124_v34 }
  0x69   :  { %331 = vsinq.f32 %v124_v34 }
  0x72   :  { %v330_v39 = vpop.eup %329 }
  0x73   :  { %v332_v40 = vpop.eup %331  ;;  %v136_v41 = vxor.u32 2147483648, %v330_v39 }
  0x74   :  { %v133_v42 = vxor.u32 2147483648, %v332_v40 }
  0x75   :  { %v240_v15 = vsel %vm238_vm9, %v136_v41, %v332_v40  ;;  %v137_v43 = vsel %vm135_vm10, %v136_v41, %v332_v40 }
  0x76   :  { %v237_v44 = vsel %vm235_vm11, %v330_v39, %v133_v42  ;;  %v134_v45 = vsel %vm132_vm12, %v330_v39, %v133_v42 }
  0x77   :  { %v241_v46 = vsel %vm234_vm13, %v237_v44, %v240_v15  ;;  %v138_v48 = vsel %vm131_vm14, %v134_v45, %v137_v43 }
  0x78   :  { %v242_v49 = vsel %vm128_vm15, nan, %v241_v46  ;;  %v139_v50 = vsel %vm128_vm15, nan, %v138_v48 }
  0x79   :  { %v244_v51 = vsub.f32 1.0, %v242_v49  ;;  %v243_v52 = vmul.f32 %v425_v11, %v139_v50 }
  0x7b   :  { %v246_v53 = vmul.f32 %v245_v47, %v244_v51  ;;  %v249_v54 = vmul.f32 %v243_v52, %v420_v2  ;;  %v248_v57 = vmul.f32 %v243_v52, %v418_v1  ;;  %v247_v58 = vmul.f32 %v243_v52, %v416_v0 }
  0x7d   :  { %v251_v55 = vmul.f32 %v246_v53, %v418_v1  ;;  %v252_v12 = vmul.f32 %v246_v53, %v420_v2  ;;  %v250_v56 = vmul.f32 %v246_v53, %v416_v0 }
  0x7f   :  { %v257_v59 = vmul.f32 %v251_v55, %v418_v1  ;;  %v258_v60 = vmul.f32 %v252_v12, %v420_v2  ;;  %v253_v61 = vmul.f32 %v250_v56, %v418_v1  ;;  %v254_v11 = vmul.f32 %v250_v56, %v420_v2 }
  0x80   :  { %v256_v62 = vmul.f32 %v250_v56, %v416_v0  ;;  %v255_v63 = vmul.f32 %v251_v55, %v420_v2 }
  0x81   :  { %v259_v3 = vadd.f32 %v258_v60, %v257_v59  ;;  %v261_v4 = vsub.f32 %v253_v61, %v249_v54  ;;  %v262_v5 = vadd.f32 %v254_v11, %v248_v57  ;;  %v263_v6 = vadd.f32 %v253_v61, %v249_v54 }
  0x82   :  { %v264_v7 = vadd.f32 %v258_v60, %v256_v62  ;;  %v266_v8 = vsub.f32 %v255_v63, %v247_v58  ;;  %v267_v9 = vsub.f32 %v254_v11, %v248_v57  ;;  %v268_v10 = vadd.f32 %v255_v63, %v247_v58 }
  0x83   :  { %v260_v13 = vsub.f32 1.0, %v259_v3  ;;  %273 = vst [vmem:[#allocation5 + $0x8] sm:$0xff] %v261_v4  ;;  %275 = vst [vmem:[#allocation5 + $0x10] sm:$0xff] %v262_v5  ;;  %v269_v1 = vadd.f32 %v257_v59, %v256_v62 }
  0x84   :  { %277 = vst [vmem:[#allocation5 + $0x18] sm:$0xff] %v263_v6  ;;  %v265_v14 = vsub.f32 1.0, %v264_v7  ;;  %281 = vst [vmem:[#allocation5 + $0x28] sm:$0xff] %v266_v8 }
  0x85   :  { %283 = vst [vmem:[#allocation5 + $0x30] sm:$0xff] %v267_v9  ;;  %285 = vst [vmem:[#allocation5 + $0x38] sm:$0xff] %v268_v10  ;;  %v270_v0 = vsub.f32 1.0, %v269_v1 }
  0x86   :  { %271 = vst [vmem:[#allocation5] sm:$0xff] %v260_v13  ;;  %279 = vst [vmem:[#allocation5 + $0x20] sm:$0xff] %v265_v14 }
  0x87   :  { %287 = vst [vmem:[#allocation5 + $0x40] sm:$0xff] %v270_v0 }
  0x88   :  { %366 = shalt.err (!%p363_p12)
}
  0x89   :  { %s367_s24 = scalar_lea.hbm %s480_s1, 1152 }
  0x8a   :  { %p368_p13 = scmp.ne.s32.totalorder %s480_s1, %s367_s24  ;;  %p371_p0 = scmp.lt.u32.totalorder %s367_s24, %s480_s1 }
  0x8c   :  { %p373_p1 = pnand %p371_p0, %p368_p13 }
  0x8e   :  { %376 = shalt.err (!%p373_p1)
}
  0x8f   :  { %299 = dma.vmem_to_hbm [thread:$0]  %s294_s20, 1152, %s480_s1, [#allocation4], %s382_s16, %s382_s16, %s383_s17  }
  0x90   :  { %379 = dma.done.wait [#allocation4], 1152  }
  0x91   :  { %380 = vsyncadd [#allocation4], 4294966144 }
  0x92   :  { %303 = vsyncpa [#allocation3], 1 }
  0x93   :  { %304 = vsyncpa [#allocation4], 1 }

</bundles_post_ra>
